<compile_context>
chip_gen: v6e
topology: v6e:2x2x1
jax: 0.10.0
libtpu: 0.0.40
codegen_flags: <defaults>
</compile_context>

<pallas_src>
import functools

import jax
import jax.numpy as jnp
from jax import lax
from jax.experimental import pallas as pl
from jax.experimental.pallas import tpu as pltpu


def _round_up(x, m):
    return (x + m - 1) // m * m


# ----------------------------------------------------------------------------- kernels


def _row_losses(x_in, tgt_col, alpha):
    """Per-row smoothed CE loss as a (TN, 1) f32 column for a (TN, C) logits tile."""
    tn, c = x_in.shape
    # Row max in the native dtype (bf16 VALU on v6e/v7x); remaining math in f32.
    m = jnp.max(x_in, axis=-1, keepdims=True).astype(jnp.float32)        # (TN,1)
    x = x_in.astype(jnp.float32)                                         # (TN,C)
    # Numerically stable full logsumexp.
    sumexp = jnp.sum(jnp.exp(x - m), axis=-1, keepdims=True)             # (TN,1)
    lse = m + jnp.log(sumexp)                                            # (TN,1)
    # loss1 = -sum(log_softmax)/C = lse - rowsum(x)/C   (sum of raw logits, f32 acc.)
    rowsum = jnp.sum(x, axis=-1, keepdims=True)                          # (TN,1)
    # loss2 (nll) = lse - x[r, tgt[r]], gathered via a masked lane reduce (no one-hot mm).
    col = lax.broadcasted_iota(jnp.int32, (tn, c), 1)
    gathered = jnp.sum(jnp.where(col == tgt_col, x, 0.0),
                       axis=-1, keepdims=True)                           # (TN,1)
    # (1-a)*loss2 + a*loss1, folded into one expression.
    return lse - (1.0 - alpha) * gathered - (alpha / c) * rowsum


def _lsce_rows_kernel(logits_ref, target_ref, out_ref, *, alpha):
    """reduction='none': per-row losses, one (TN,1) output block per tile."""
    out_ref[...] = _row_losses(logits_ref[...], target_ref[...], alpha)


def _lsce_partial_kernel(logits_ref, target_ref, out_ref, *, alpha, n_rows, tile_rows):
    """reduction in {'mean','sum'}: masked per-tile partial sum (no per-row writeback)."""
    loss = _row_losses(logits_ref[...], target_ref[...], alpha)          # (TN,1)
    # Mask rows of the ragged tail block (their logits/targets are unspecified).
    row0 = pl.program_id(0) * tile_rows
    row = row0 + lax.broadcasted_iota(jnp.int32, loss.shape, 0)
    loss = jnp.where(row < n_rows, loss, 0.0)
    partial = jnp.sum(loss, axis=0, keepdims=True)                       # (1,1)
    # Store the scalar at position (0,0) of this tile's (8,128) output slab.
    r_i = lax.broadcasted_iota(jnp.int32, (8, 128), 0)
    c_i = lax.broadcasted_iota(jnp.int32, (8, 128), 1)
    out_ref[0] = jnp.where((r_i == 0) & (c_i == 0), partial, 0.0)


# ----------------------------------------------------------------------------- wrapper

_VMEM_TILE_BUDGET = 12 * 1024 * 1024   # streamed buffers + temporaries per grid step
_COL_BYTES = 128 * 4                   # a (TN,1) 32-bit column pads to a full 128-lane row


def _pick_tile_rows(n, c, itemsize):
    if n <= 8:
        return n                       # single block equal to the full row extent
    c_pad = max(_round_up(c, 128), 128)
    # Per-row VMEM cost with 128-lane padding counted:
    #   double-buffered logits tile + (TN,1) target column + (TN,1) output column,
    #   plus headroom for in-kernel f32 temporaries (cast / exp / masked select).
    row_bytes = 2 * (c_pad * itemsize + _COL_BYTES)    # logits + target, x2 buffers
    row_bytes += 2 * _COL_BYTES                        # per-row output, x2 buffers
    row_bytes += 3 * c_pad * 4                         # f32 temporaries headroom
    tn = max(8, (_VMEM_TILE_BUDGET // row_bytes) // 8 * 8)
    # Ensure >=2 grid steps when possible so both v7x TensorCores get work.
    tn = min(tn, _round_up(int(pl.cdiv(n, 2)), 8))
    return int(tn)


def label_smoothing_cross_entropy(output, target, alpha=0.2, reduction="mean"):
    """output: [N, C] float logits; target: [N] int labels.

    Returns a scalar for reduction in {'mean','sum'}, else per-row losses [N]."""
    n, c = output.shape
    itemsize = jnp.dtype(output.dtype).itemsize
    tn = _pick_tile_rows(n, c, itemsize)
    num_tiles = int(pl.cdiv(n, tn))

    tgt2d = target.astype(jnp.int32).reshape(n, 1)
    in_specs = [
        pl.BlockSpec((tn, c), lambda i: (i, 0)),
        pl.BlockSpec((tn, 1), lambda i: (i, 0)),
    ]
    compiler_params = pltpu.CompilerParams(
        dimension_semantics=("parallel",),
        vmem_limit_bytes=32 * 1024 * 1024,   # < v7x 64 MiB physical; plenty on v5e/v6e
    )

    if reduction in ("mean", "sum"):
        kernel = functools.partial(_lsce_partial_kernel, alpha=float(alpha),
                                   n_rows=n, tile_rows=tn)
        partials = pl.pallas_call(
            kernel,
            out_shape=jax.ShapeDtypeStruct((num_tiles, 8, 128), jnp.float32),
            grid=(num_tiles,),
            in_specs=in_specs,
            out_specs=pl.BlockSpec((1, 8, 128), lambda i: (i, 0, 0)),
            compiler_params=compiler_params,
        )(output, tgt2d)
        total = jnp.sum(partials[:, 0, 0])
        return total / n if reduction == "mean" else total

    # reduction == 'none' (matches reduce_loss fall-through): per-row losses.
    kernel = functools.partial(_lsce_rows_kernel, alpha=float(alpha))
    per_row = pl.pallas_call(
        kernel,
        out_shape=jax.ShapeDtypeStruct((n, 1), jnp.float32),
        grid=(num_tiles,),
        in_specs=in_specs,
        out_specs=pl.BlockSpec((tn, 1), lambda i: (i, 0)),
        compiler_params=compiler_params,
    )(output, tgt2d)
    return per_row[:, 0]


# ---------------------------------------------------------------------------- reference


def _reference(output, target, alpha=0.2, reduction="mean"):
    # pure-JAX reference of the PyTorch forward
    c = output.shape[-1]
    log_preds = jax.nn.log_softmax(output.astype(jnp.float32), axis=-1)
    loss1 = -jnp.sum(log_preds, axis=-1) / c
    loss2 = -jnp.take_along_axis(
        log_preds, target.astype(jnp.int32)[:, None], axis=-1)[:, 0]
    if reduction == "mean":
        loss1, loss2 = jnp.mean(loss1), jnp.mean(loss2)
    elif reduction == "sum":
        loss1, loss2 = jnp.sum(loss1), jnp.sum(loss2)
    return (1.0 - alpha) * loss2 + alpha * loss1


if __name__ == "__main__":
    key = jax.random.PRNGKey(0)
    k1, k2, k3, k4 = jax.random.split(key, 4)

    # small shapes consistent with the module: [batch, num_classes] logits
    N1, C1 = 8, 32
    logits1 = jax.random.normal(k1, (N1, C1), dtype=jnp.float32)
    target1 = jax.random.randint(k2, (N1,), 0, C1, dtype=jnp.int32)

    loss = jax.block_until_ready(
        label_smoothing_cross_entropy(logits1, target1, alpha=0.2, reduction="mean"))
    ref = _reference(logits1, target1, alpha=0.2, reduction="mean")
    assert jnp.allclose(loss, ref, atol=1e-5, rtol=1e-5), (loss, ref)

    # ragged batch (exercises the un-padded ragged last block) + 'none' and 'sum'
    N2, C2 = 13, 40
    logits2 = jax.random.normal(k3, (N2, C2), dtype=jnp.float32)
    target2 = jax.random.randint(k4, (N2,), 0, C2, dtype=jnp.int32)

    loss_none = jax.block_until_ready(
        label_smoothing_cross_entropy(logits2, target2, alpha=0.2, reduction="none"))
    ref_none = _reference(logits2, target2, alpha=0.2, reduction="none")
    assert loss_none.shape == (N2,)
    assert jnp.allclose(loss_none, ref_none, atol=1e-5, rtol=1e-5), (loss_none, ref_none)

    loss_sum = jax.block_until_ready(
        label_smoothing_cross_entropy(logits2, target2, alpha=0.2, reduction="sum"))
    ref_sum = _reference(logits2, target2, alpha=0.2, reduction="sum")
    assert jnp.allclose(loss_sum, ref_sum, atol=1e-4, rtol=1e-5), (loss_sum, ref_sum)

    print("KERNEL_OK")
</pallas_src>

<mosaic_0001>
module attributes {stable_mosaic.version = 11 : i64} {
  func.func @_lsce_partial_kernel(%arg0: i32, %arg1: memref<8x32xf32, #tpu.memory_space<vmem>>, %arg2: memref<8x1xi32, #tpu.memory_space<vmem>>, %arg3: memref<1x8x128xf32, #tpu.memory_space<vmem>>) attributes {dimension_semantics = [#tpu.dimension_semantics<parallel>], iteration_bounds = array<i64: 1>, scalar_prefetch = 0 : i64, scratch_operands = 0 : i64, tpu.core_type = #tpu.core_type<tc>, window_params = [{transform_indices = @transform_0, window_bounds = array<i64: 8, 32>}, {transform_indices = @transform_1, window_bounds = array<i64: 8, 1>}, {transform_indices = @transform_2, window_bounds = array<i64: 1, 8, 128>}]} {
    %c0 = arith.constant 0 : index
    %c0_0 = arith.constant 0 : index
    %0 = vector.load %arg1[%c0, %c0_0] : memref<8x32xf32, #tpu.memory_space<vmem>>, vector<8x32xf32>
    %c0_1 = arith.constant 0 : index
    %c0_2 = arith.constant 0 : index
    %1 = vector.load %arg2[%c0_1, %c0_2] : memref<8x1xi32, #tpu.memory_space<vmem>>, vector<8x1xi32>
    %cst = arith.constant dense<0xFF800000> : vector<8xf32>
    %2 = vector.multi_reduction <maximumf>, %0, %cst [1] : vector<8x32xf32> to vector<8xf32>
    %3 = vector.shape_cast %2 : vector<8xf32> to vector<8x1xf32>
    %4 = vector.broadcast %3 : vector<8x1xf32> to vector<8x32xf32>
    %5 = arith.subf %0, %4 : vector<8x32xf32>
    %6 = math.exp %5 : vector<8x32xf32>
    %cst_3 = arith.constant dense<0.000000e+00> : vector<8xf32>
    %7 = vector.multi_reduction <add>, %6, %cst_3 [1] : vector<8x32xf32> to vector<8xf32>
    %8 = vector.shape_cast %7 : vector<8xf32> to vector<8x1xf32>
    %9 = math.log %8 : vector<8x1xf32>
    %10 = arith.addf %3, %9 : vector<8x1xf32>
    %cst_4 = arith.constant dense<0.000000e+00> : vector<8xf32>
    %11 = vector.multi_reduction <add>, %0, %cst_4 [1] : vector<8x32xf32> to vector<8xf32>
    %12 = vector.shape_cast %11 : vector<8xf32> to vector<8x1xf32>
    %13 = tpu.iota {dimensions = array<i32: 1>} : vector<8x32xi32>
    %14 = vector.broadcast %1 : vector<8x1xi32> to vector<8x32xi32>
    %15 = arith.cmpi eq, %13, %14 : vector<8x32xi32>
    %cst_5 = arith.constant 0.000000e+00 : f32
    %16 = vector.broadcast %cst_5 : f32 to vector<8x32xf32>
    %17 = arith.select %15, %0, %16 : vector<8x32xi1>, vector<8x32xf32>
    %cst_6 = arith.constant dense<0.000000e+00> : vector<8xf32>
    %18 = vector.multi_reduction <add>, %17, %cst_6 [1] : vector<8x32xf32> to vector<8xf32>
    %19 = vector.shape_cast %18 : vector<8xf32> to vector<8x1xf32>
    %cst_7 = arith.constant 8.000000e-01 : f32
    %20 = vector.broadcast %cst_7 : f32 to vector<8x1xf32>
    %21 = arith.mulf %20, %19 : vector<8x1xf32>
    %22 = arith.subf %10, %21 : vector<8x1xf32>
    %cst_8 = arith.constant 6.250000e-03 : f32
    %23 = vector.broadcast %cst_8 : f32 to vector<8x1xf32>
    %24 = arith.mulf %23, %12 : vector<8x1xf32>
    %25 = arith.subf %22, %24 : vector<8x1xf32>
    %c8_i32 = arith.constant 8 : i32
    %26 = arith.muli %arg0, %c8_i32 : i32
    %27 = tpu.iota {dimensions = array<i32: 0>} : vector<8x1xi32>
    %28 = vector.broadcast %26 : i32 to vector<8x1xi32>
    %29 = arith.addi %28, %27 : vector<8x1xi32>
    %c8_i32_9 = arith.constant 8 : i32
    %30 = vector.broadcast %c8_i32_9 : i32 to vector<8x1xi32>
    %31 = arith.cmpi slt, %29, %30 : vector<8x1xi32>
    %cst_10 = arith.constant 0.000000e+00 : f32
    %32 = vector.broadcast %cst_10 : f32 to vector<8x1xf32>
    %33 = arith.select %31, %25, %32 : vector<8x1xi1>, vector<8x1xf32>
    %cst_11 = arith.constant dense<0.000000e+00> : vector<1xf32>
    %34 = vector.multi_reduction <add>, %33, %cst_11 [0] : vector<8x1xf32> to vector<1xf32>
    %35 = vector.shape_cast %34 : vector<1xf32> to vector<1x1xf32>
    %36 = tpu.iota {dimensions = array<i32: 0>} : vector<8x128xi32>
    %37 = tpu.iota {dimensions = array<i32: 1>} : vector<8x128xi32>
    %c0_i32 = arith.constant 0 : i32
    %38 = vector.broadcast %c0_i32 : i32 to vector<8x128xi32>
    %39 = arith.cmpi eq, %36, %38 : vector<8x128xi32>
    %c0_i32_12 = arith.constant 0 : i32
    %40 = vector.broadcast %c0_i32_12 : i32 to vector<8x128xi32>
    %41 = arith.cmpi eq, %37, %40 : vector<8x128xi32>
    %42 = arith.andi %39, %41 : vector<8x128xi1>
    %cst_13 = arith.constant 0.000000e+00 : f32
    %43 = vector.shape_cast %35 : vector<1x1xf32> to vector<1x1xf32>
    %44 = vector.broadcast %43 : vector<1x1xf32> to vector<8x128xf32>
    %45 = vector.broadcast %cst_13 : f32 to vector<8x128xf32>
    %46 = arith.select %42, %44, %45 : vector<8x128xi1>, vector<8x128xf32>
    %c0_14 = arith.constant 0 : index
    %c0_15 = arith.constant 0 : index
    %c0_16 = arith.constant 0 : index
    %47 = vector.load %arg3[%c0_14, %c0_15, %c0_16] : memref<1x8x128xf32, #tpu.memory_space<vmem>>, vector<1x8x128xf32>
    %48 = vector.shape_cast %47 : vector<1x8x128xf32> to vector<8x128xf32>
    %49 = vector.shape_cast %46 : vector<8x128xf32> to vector<1x8x128xf32>
    tpu.vector_store %arg3[%c0_14, %c0_15, %c0_16], %49 {strides = array<i32>} : memref<1x8x128xf32, #tpu.memory_space<vmem>>, vector<1x8x128xf32>,
    return
  }
  func.func @transform_0(%arg0: i32) -> (i32, i32) {
    %c0_i32 = arith.constant 0 : i32
    %c0_i32_0 = arith.constant 0 : i32
    return %arg0, %c0_i32 : i32, i32
  }
  func.func @transform_1(%arg0: i32) -> (i32, i32) {
    %c0_i32 = arith.constant 0 : i32
    %c0_i32_0 = arith.constant 0 : i32
    return %arg0, %c0_i32 : i32, i32
  }
  func.func @transform_2(%arg0: i32) -> (i32, i32, i32) {
    %c0_i32 = arith.constant 0 : i32
    %c0_i32_0 = arith.constant 0 : i32
    %c0_i32_1 = arith.constant 0 : i32
    return %arg0, %c0_i32, %c0_i32_0 : i32, i32, i32
  }
}

</mosaic_0001>

<bundles_post_ra>
// kernel: tpu_custom_call.1
= control target key start
LH: loop header
LB: loop body
LE: loop exit
PB: predicated region body
PF: predicated region fallthrough
CT: control target
= control target key end

     0   :  { %vm14_vm0 = vcmask 261120   ;;  %s135_s0 = inlined_call_operand.vmem [shape: f32[8,32], index: 0, kind: input, shape index: {}]   ;;  %s136_s1 = inlined_call_operand.vmem [shape: s32[8,1], index: 1, kind: input, shape index: {}]   ;;  %s137_s2 = inlined_call_operand.hbm [shape: f32[1,8,128], index: 2, kind: output, shape index: {}]  }
   0x1   :  { %v12_v0 = vld [vmem:[%s135_s0] sm:$0xff] }
   0x2   :  { %7 = vsyncpa [#allocation3], 0  ;;  %v15_v1 = vsel %vm14_vm0, %v12_v0, -inf  ;;  %v105_v2 = vmov 0   ;;  %v13_v3 = vld [vmem:[%s136_s1] sm:$0xff]  ;;  %v30_v7 = vlaneseq  ;;  %v27_v14 = vsel %vm14_vm0, %v12_v0, 0.0 }
   0x3   :  { %78 = vset.pattern.permute.xlu0 %v105_v2  ;;  %s106_s0 = smov [#allocation2]  }
   0x4   :  { %16 = vmax.xlane.f32.xlu0 %v15_v1  ;;  %v31_v8 = vand.u32 127, %v30_v7  ;;  %v46_v27 = vshrl.u32 %v30_v7, 7  ;;  %s68_s1 = sshll.u32 %s106_s0, 4  ;;  %s69_s1 = int_to_ptr.vmem [resolvable:$true] %s68_s1 }
   0x5   :  { %s83_s13 = scalar_lea.vmem %s69_s1, 128  ;;  %p88_p1 = scmp.lt.s32.totalorder %s69_s1, %s69_s1 }
   0x6   :  { %vm57_vm2 = vcmp.eq.s32.totalorder %v46_v27, 0  ;;  %vm58_vm3 = vcmp.eq.s32.totalorder %v31_v8, 0  ;;  %p84_p0 = scmp.ne.s32.totalorder %s69_s1, %s83_s13  ;;  %p89_p2 = scmp.lt.s32.totalorder %s83_s13, %s83_s13 }
   0x7   :  { %vm59_vm4 = vmand %vm57_vm2, %vm58_vm3 }
   0x8   :  { %p90_p3 = por %p89_p2, %p88_p1 }
   0xa   :  { %p91_p4 = pnand %p90_p3, %p84_p0 }
  0x1a   :  { %33 = vperm.xlu0 %78, %v13_v3  }
  0x8d   :  { %v17_v4 = vpop.xlane.xlu0 %16 }
  0x8e   :  { %v18_v5 = vsub.f32 %v12_v0, %v17_v4 }
  0x90   :  { %v19_v6 = vmul.f32 1.442695, %v18_v5 }
  0x92   :  { %79 = vpow2.f32 %v19_v6 }
  0x95   :  { %v34_v9 = vpop.permute.xlu0 %33 }
  0x96   :  { %vm35_vm1 = vcmp.eq.s32.totalorder %v31_v8, %v34_v9 }
  0x97   :  { %v36_v11 = vsel %vm35_vm1, %v12_v0, 0.0 }
  0x98   :  { %v37_v13 = vsel %vm14_vm0, %v36_v11, 0.0 }
  0x9f   :  { %v80_v10 = vpop.eup %79 }
  0xa0   :  { %v21_v12 = vsel %vm14_vm0, %v80_v10, 0.0 }
  0xa1   :  { %22 = vadd.xlane.f32.xlu1 %v21_v12 }
  0xa5   :  { %38 = vadd.xlane.f32.xlu1 %v37_v13 }
  0xa9   :  { %28 = vadd.xlane.f32.xlu1 %v27_v14 }
 0x12a   :  { %v23_v15 = vpop.xlane.xlu1 %22 }
 0x12b   :  { %81 = vlog2.f32 %v23_v15 }
 0x12e   :  { %v39_v16 = vpop.xlane.xlu1 %38 }
 0x12f   :  { %v40_v21 = vmul.f32 0.8, %v39_v16 }
 0x132   :  { %v29_v18 = vpop.xlane.xlu1 %28 }
 0x133   :  { %v42_v22 = vmul.f32 0.00625, %v29_v18 }
 0x138   :  { %v82_v17 = vpop.eup %81 }
 0x139   :  { %v25_v19 = vmul.f32 0.6931472, %v82_v17 }
 0x13b   :  { %v26_v20 = vadd.f32 %v25_v19, %v17_v4 }
 0x13d   :  { %v41_v23 = vsub.f32 %v26_v20, %v40_v21 }
 0x13f   :  { %v43_v24 = vsub.f32 %v41_v23, %v42_v22 }
 0x141   :  { %v51_v25 = vrot.slane %v43_v24, 4 }
 0x143   :  { %v52_v26 = vadd.f32 %v51_v25, %v43_v24 }
 0x145   :  { %v53_v28 = vrot.slane %v52_v26, 2 }
 0x147   :  { %v54_v29 = vadd.f32 %v53_v28, %v52_v26 }
 0x149   :  { %v55_v30 = vrot.slane %v54_v29, 1 }
 0x14b   :  { %v56_v31 = vadd.f32 %v55_v30, %v54_v29 }
 0x14d   :  { %v60_v32 = vsel %vm59_vm4, %v56_v31, 0.0 }
 0x14e   :  { %61 = vst [vmem:[#allocation2] sm:$0xff] %v60_v32 }
 0x14f   :  { %94 = shalt.err (!%p91_p4)
}
 0x150   :  { %71 = dma.vmem_to_hbm [thread:$0]  %s69_s1, 128, %s137_s2, [#allocation3]  }
 0x151   :  { %103 = dma.done.wait [#allocation3], 128  }
 0x152   :  { %104 = vsyncadd [#allocation3], 4294967168 }
 0x153   :  { %75 = vsyncpa [#allocation3], 1 }

</bundles_post_ra>
